<compile_context>
chip_gen: v7x
topology: tpu7x:2x2x1
jax: 0.10.0
libtpu: 0.0.40
codegen_flags: <defaults>
</compile_context>

<pallas_src>
from functools import partial

import jax
import jax.numpy as jnp
from jax.experimental import pallas as pl
from jax.experimental.pallas import tpu as pltpu

NUM_EMBEDDINGS = 10
EMBEDDING_DIM = 3

LANE = 128
_TARGET_BLOCK_ROWS = 256        # 256 rows * 128 lanes = 32768 indices per grid step
_SMALL_N_FASTPATH = 4096        # below this, a plain XLA gather is faster end-to-end


def _embedding_kernel(idx_ref, table_ref, out_ref, *, num_embeddings, embedding_dim):
    """Gather rows of a tiny embedding table via VPU selects.

    idx_ref   : (R, 128)    int32   VMEM   sublane+lane dense index block
    table_ref : (V*D,)      float32 SMEM   flattened embedding table (row-major)
    out_ref   : (D, R, 128) float32 VMEM   lane-dense, transposed output block
    """
    idx = idx_ref[...]                                        # (R, 128) int32

    accs = [jnp.zeros(idx.shape, jnp.float32) for _ in range(embedding_dim)]

    # v-outer / d-inner: only one mask is live at a time (1 mask + D accs + idx),
    # so no vreg spills even with large blocks.  OOB / padded indices stay 0.
    for v in range(num_embeddings):
        mask = idx == v
        for d in range(embedding_dim):
            # scalar broadcast from SMEM; pure VPU select, no MXU, no one-hot.
            accs[d] = jnp.where(mask, table_ref[v * embedding_dim + d], accs[d])

    # Direct per-row stores straight from the accumulator vregs (no concatenate).
    for d in range(embedding_dim):
        out_ref[d] = accs[d]


def embedding_forward(indices, table, *, force_pallas=False):
    """Equivalent of nn.Embedding(V, D)(indices).

    indices: integer array of any shape, values in [0, V).
    table  : (V, D) embedding weights.
    Returns array of shape indices.shape + (D,) with table.dtype.
    """
    assert jnp.issubdtype(indices.dtype, jnp.integer), "indices must be integer"
    orig_shape = indices.shape
    v, d = table.shape
    out_dtype = table.dtype

    flat = indices.reshape(-1).astype(jnp.int32)              # (N,)
    n = flat.shape[0]

    # Small-N fast path: Pallas dispatch + padding overhead dwarfs the work.
    if n < _SMALL_N_FASTPATH and not force_pallas:
        return table[flat].reshape(orig_shape + (d,))

    # Sublane+lane dense index layout: (rows, 128), rows padded so the block
    # shape divides it.  Aim for >= 2 grid steps (v7x megacore) when possible.
    rows = pl.cdiv(n, LANE)
    if rows >= 2 * _TARGET_BLOCK_ROWS:
        rows_per_block = _TARGET_BLOCK_ROWS
    else:
        half = pl.cdiv(rows, 2)
        rows_per_block = max(8, pl.cdiv(half, 8) * 8)         # multiple of 8 sublanes
    rows_pad = pl.cdiv(rows, rows_per_block) * rows_per_block
    n_pad = rows_pad * LANE

    # Pad with -1 (out of vocab) so padded slots produce zeros; sliced off below.
    idx_pad = jnp.full((n_pad,), -1, jnp.int32).at[:n].set(flat)
    idx2d = idx_pad.reshape(rows_pad, LANE)

    table_flat = table.astype(jnp.float32).reshape(-1)        # (V*D,) -> SMEM

    grid = (rows_pad // rows_per_block,)
    cost = pl.CostEstimate(
        flops=(v + v * d) * n_pad,                            # 10 cmp + 30 select / idx
        transcendentals=0,
        bytes_accessed=4 * n_pad + 4 * d * n_pad + 4 * v * d, # idx in + out + table
    )

    out = pl.pallas_call(
        partial(_embedding_kernel, num_embeddings=v, embedding_dim=d),
        out_shape=jax.ShapeDtypeStruct((d, rows_pad, LANE), jnp.float32),
        grid=grid,
        in_specs=[
            # (rows_per_block, 128): sublane+lane dense index block, double-buffered.
            pl.BlockSpec((rows_per_block, LANE), lambda i: (i, 0)),
            # Tiny table lives whole in SMEM, resident across all grid steps.
            pl.BlockSpec(memory_space=pltpu.MemorySpace.SMEM),
        ],
        # (d, rows_per_block, 128): lane-dense output block -> unmasked full vst.
        out_specs=pl.BlockSpec((d, rows_per_block, LANE), lambda i: (0, i, 0)),
        compiler_params=pltpu.CompilerParams(
            dimension_semantics=("parallel",),                # megacore split on v7x
        ),
        cost_estimate=cost,
    )(idx2d, table_flat)

    # (D, rows_pad, 128) -> (N, D); XLA fuses transpose + reshape + slice.
    # TODO(synk): consumers that can take the (D, N) layout directly should, to
    # skip this extra HBM pass once the kernel itself is memory-bound.
    out_nd = out.transpose(1, 2, 0).reshape(n_pad, d)[:n]
    return out_nd.astype(out_dtype).reshape(orig_shape + (d,))


if __name__ == "__main__":
    key = jax.random.PRNGKey(0)
    k_table, k_small, k_med = jax.random.split(key, 3)

    # Deterministic parameters, same distribution as nn.Embedding (N(0, 1)).
    table = jax.random.normal(
        k_table, (NUM_EMBEDDINGS, EMBEDDING_DIM), dtype=jnp.float32
    )

    # Small input consistent with the module's usage (batch=2, seq=8),
    # forced through the Pallas kernel to exercise it.
    idx_small = jax.random.randint(
        k_small, (2, 8), minval=0, maxval=NUM_EMBEDDINGS, dtype=jnp.int32
    )
    out_small = jax.block_until_ready(
        embedding_forward(idx_small, table, force_pallas=True)
    )
    assert out_small.shape == (2, 8, EMBEDDING_DIM), out_small.shape
    assert jnp.allclose(out_small, table[idx_small], atol=1e-6), "small-N mismatch"

    # Medium input exercising the sublane-dense, >=2-step gridded path.
    idx_med = jax.random.randint(
        k_med, (4, 512), minval=0, maxval=NUM_EMBEDDINGS, dtype=jnp.int32
    )
    out_med = jax.block_until_ready(
        embedding_forward(idx_med, table, force_pallas=True)
    )
    assert out_med.shape == (4, 512, EMBEDDING_DIM), out_med.shape
    assert jnp.allclose(out_med, table[idx_med], atol=1e-6), "medium-N mismatch"

    # Fast-path sanity check (plain XLA gather for tiny inputs).
    out_fast = jax.block_until_ready(embedding_forward(idx_small, table))
    assert jnp.allclose(out_fast, table[idx_small], atol=1e-6), "fast-path mismatch"

    print("KERNEL_OK")
</pallas_src>

<mosaic_0001>
module attributes {stable_mosaic.version = 11 : i64} {
  func.func @_embedding_kernel(%arg0: i32, %arg1: memref<8x128xi32, #tpu.memory_space<vmem>>, %arg2: memref<30xf32, #tpu.memory_space<smem>>, %arg3: memref<3x8x128xf32, #tpu.memory_space<vmem>>) attributes {dimension_semantics = [#tpu.dimension_semantics<parallel>], iteration_bounds = array<i64: 1>, scalar_prefetch = 0 : i64, scratch_operands = 0 : i64, tpu.core_type = #tpu.core_type<tc>, window_params = [{transform_indices = @transform_0, window_bounds = array<i64: 8, 128>}, {transform_indices = @transform_1, window_bounds = array<i64: 30>}, {transform_indices = @transform_2, window_bounds = array<i64: 3, 8, 128>}]} {
    %c0 = arith.constant 0 : index
    %c0_0 = arith.constant 0 : index
    %0 = vector.load %arg1[%c0, %c0_0] : memref<8x128xi32, #tpu.memory_space<vmem>>, vector<8x128xi32>
    %cst = arith.constant 0.000000e+00 : f32
    %1 = vector.broadcast %cst : f32 to vector<8x128xf32>
    %cst_1 = arith.constant 0.000000e+00 : f32
    %2 = vector.broadcast %cst_1 : f32 to vector<8x128xf32>
    %cst_2 = arith.constant 0.000000e+00 : f32
    %3 = vector.broadcast %cst_2 : f32 to vector<8x128xf32>
    %c0_i32 = arith.constant 0 : i32
    %4 = vector.broadcast %c0_i32 : i32 to vector<8x128xi32>
    %5 = arith.cmpi eq, %0, %4 : vector<8x128xi32>
    %c0_3 = arith.constant 0 : index
    %6 = memref.load %arg2[%c0_3] : memref<30xf32, #tpu.memory_space<smem>>
    %7 = vector.broadcast %6 : f32 to vector<8x128xf32>
    %8 = arith.select %5, %7, %1 : vector<8x128xi1>, vector<8x128xf32>
    %c1 = arith.constant 1 : index
    %9 = memref.load %arg2[%c1] : memref<30xf32, #tpu.memory_space<smem>>
    %10 = vector.broadcast %9 : f32 to vector<8x128xf32>
    %11 = arith.select %5, %10, %2 : vector<8x128xi1>, vector<8x128xf32>
    %c2 = arith.constant 2 : index
    %12 = memref.load %arg2[%c2] : memref<30xf32, #tpu.memory_space<smem>>
    %13 = vector.broadcast %12 : f32 to vector<8x128xf32>
    %14 = arith.select %5, %13, %3 : vector<8x128xi1>, vector<8x128xf32>
    %c1_i32 = arith.constant 1 : i32
    %15 = vector.broadcast %c1_i32 : i32 to vector<8x128xi32>
    %16 = arith.cmpi eq, %0, %15 : vector<8x128xi32>
    %c3 = arith.constant 3 : index
    %17 = memref.load %arg2[%c3] : memref<30xf32, #tpu.memory_space<smem>>
    %18 = vector.broadcast %17 : f32 to vector<8x128xf32>
    %19 = arith.select %16, %18, %8 : vector<8x128xi1>, vector<8x128xf32>
    %c4 = arith.constant 4 : index
    %20 = memref.load %arg2[%c4] : memref<30xf32, #tpu.memory_space<smem>>
    %21 = vector.broadcast %20 : f32 to vector<8x128xf32>
    %22 = arith.select %16, %21, %11 : vector<8x128xi1>, vector<8x128xf32>
    %c5 = arith.constant 5 : index
    %23 = memref.load %arg2[%c5] : memref<30xf32, #tpu.memory_space<smem>>
    %24 = vector.broadcast %23 : f32 to vector<8x128xf32>
    %25 = arith.select %16, %24, %14 : vector<8x128xi1>, vector<8x128xf32>
    %c2_i32 = arith.constant 2 : i32
    %26 = vector.broadcast %c2_i32 : i32 to vector<8x128xi32>
    %27 = arith.cmpi eq, %0, %26 : vector<8x128xi32>
    %c6 = arith.constant 6 : index
    %28 = memref.load %arg2[%c6] : memref<30xf32, #tpu.memory_space<smem>>
    %29 = vector.broadcast %28 : f32 to vector<8x128xf32>
    %30 = arith.select %27, %29, %19 : vector<8x128xi1>, vector<8x128xf32>
    %c7 = arith.constant 7 : index
    %31 = memref.load %arg2[%c7] : memref<30xf32, #tpu.memory_space<smem>>
    %32 = vector.broadcast %31 : f32 to vector<8x128xf32>
    %33 = arith.select %27, %32, %22 : vector<8x128xi1>, vector<8x128xf32>
    %c8 = arith.constant 8 : index
    %34 = memref.load %arg2[%c8] : memref<30xf32, #tpu.memory_space<smem>>
    %35 = vector.broadcast %34 : f32 to vector<8x128xf32>
    %36 = arith.select %27, %35, %25 : vector<8x128xi1>, vector<8x128xf32>
    %c3_i32 = arith.constant 3 : i32
    %37 = vector.broadcast %c3_i32 : i32 to vector<8x128xi32>
    %38 = arith.cmpi eq, %0, %37 : vector<8x128xi32>
    %c9 = arith.constant 9 : index
    %39 = memref.load %arg2[%c9] : memref<30xf32, #tpu.memory_space<smem>>
    %40 = vector.broadcast %39 : f32 to vector<8x128xf32>
    %41 = arith.select %38, %40, %30 : vector<8x128xi1>, vector<8x128xf32>
    %c10 = arith.constant 10 : index
    %42 = memref.load %arg2[%c10] : memref<30xf32, #tpu.memory_space<smem>>
    %43 = vector.broadcast %42 : f32 to vector<8x128xf32>
    %44 = arith.select %38, %43, %33 : vector<8x128xi1>, vector<8x128xf32>
    %c11 = arith.constant 11 : index
    %45 = memref.load %arg2[%c11] : memref<30xf32, #tpu.memory_space<smem>>
    %46 = vector.broadcast %45 : f32 to vector<8x128xf32>
    %47 = arith.select %38, %46, %36 : vector<8x128xi1>, vector<8x128xf32>
    %c4_i32 = arith.constant 4 : i32
    %48 = vector.broadcast %c4_i32 : i32 to vector<8x128xi32>
    %49 = arith.cmpi eq, %0, %48 : vector<8x128xi32>
    %c12 = arith.constant 12 : index
    %50 = memref.load %arg2[%c12] : memref<30xf32, #tpu.memory_space<smem>>
    %51 = vector.broadcast %50 : f32 to vector<8x128xf32>
    %52 = arith.select %49, %51, %41 : vector<8x128xi1>, vector<8x128xf32>
    %c13 = arith.constant 13 : index
    %53 = memref.load %arg2[%c13] : memref<30xf32, #tpu.memory_space<smem>>
    %54 = vector.broadcast %53 : f32 to vector<8x128xf32>
    %55 = arith.select %49, %54, %44 : vector<8x128xi1>, vector<8x128xf32>
    %c14 = arith.constant 14 : index
    %56 = memref.load %arg2[%c14] : memref<30xf32, #tpu.memory_space<smem>>
    %57 = vector.broadcast %56 : f32 to vector<8x128xf32>
    %58 = arith.select %49, %57, %47 : vector<8x128xi1>, vector<8x128xf32>
    %c5_i32 = arith.constant 5 : i32
    %59 = vector.broadcast %c5_i32 : i32 to vector<8x128xi32>
    %60 = arith.cmpi eq, %0, %59 : vector<8x128xi32>
    %c15 = arith.constant 15 : index
    %61 = memref.load %arg2[%c15] : memref<30xf32, #tpu.memory_space<smem>>
    %62 = vector.broadcast %61 : f32 to vector<8x128xf32>
    %63 = arith.select %60, %62, %52 : vector<8x128xi1>, vector<8x128xf32>
    %c16 = arith.constant 16 : index
    %64 = memref.load %arg2[%c16] : memref<30xf32, #tpu.memory_space<smem>>
    %65 = vector.broadcast %64 : f32 to vector<8x128xf32>
    %66 = arith.select %60, %65, %55 : vector<8x128xi1>, vector<8x128xf32>
    %c17 = arith.constant 17 : index
    %67 = memref.load %arg2[%c17] : memref<30xf32, #tpu.memory_space<smem>>
    %68 = vector.broadcast %67 : f32 to vector<8x128xf32>
    %69 = arith.select %60, %68, %58 : vector<8x128xi1>, vector<8x128xf32>
    %c6_i32 = arith.constant 6 : i32
    %70 = vector.broadcast %c6_i32 : i32 to vector<8x128xi32>
    %71 = arith.cmpi eq, %0, %70 : vector<8x128xi32>
    %c18 = arith.constant 18 : index
    %72 = memref.load %arg2[%c18] : memref<30xf32, #tpu.memory_space<smem>>
    %73 = vector.broadcast %72 : f32 to vector<8x128xf32>
    %74 = arith.select %71, %73, %63 : vector<8x128xi1>, vector<8x128xf32>
    %c19 = arith.constant 19 : index
    %75 = memref.load %arg2[%c19] : memref<30xf32, #tpu.memory_space<smem>>
    %76 = vector.broadcast %75 : f32 to vector<8x128xf32>
    %77 = arith.select %71, %76, %66 : vector<8x128xi1>, vector<8x128xf32>
    %c20 = arith.constant 20 : index
    %78 = memref.load %arg2[%c20] : memref<30xf32, #tpu.memory_space<smem>>
    %79 = vector.broadcast %78 : f32 to vector<8x128xf32>
    %80 = arith.select %71, %79, %69 : vector<8x128xi1>, vector<8x128xf32>
    %c7_i32 = arith.constant 7 : i32
    %81 = vector.broadcast %c7_i32 : i32 to vector<8x128xi32>
    %82 = arith.cmpi eq, %0, %81 : vector<8x128xi32>
    %c21 = arith.constant 21 : index
    %83 = memref.load %arg2[%c21] : memref<30xf32, #tpu.memory_space<smem>>
    %84 = vector.broadcast %83 : f32 to vector<8x128xf32>
    %85 = arith.select %82, %84, %74 : vector<8x128xi1>, vector<8x128xf32>
    %c22 = arith.constant 22 : index
    %86 = memref.load %arg2[%c22] : memref<30xf32, #tpu.memory_space<smem>>
    %87 = vector.broadcast %86 : f32 to vector<8x128xf32>
    %88 = arith.select %82, %87, %77 : vector<8x128xi1>, vector<8x128xf32>
    %c23 = arith.constant 23 : index
    %89 = memref.load %arg2[%c23] : memref<30xf32, #tpu.memory_space<smem>>
    %90 = vector.broadcast %89 : f32 to vector<8x128xf32>
    %91 = arith.select %82, %90, %80 : vector<8x128xi1>, vector<8x128xf32>
    %c8_i32 = arith.constant 8 : i32
    %92 = vector.broadcast %c8_i32 : i32 to vector<8x128xi32>
    %93 = arith.cmpi eq, %0, %92 : vector<8x128xi32>
    %c24 = arith.constant 24 : index
    %94 = memref.load %arg2[%c24] : memref<30xf32, #tpu.memory_space<smem>>
    %95 = vector.broadcast %94 : f32 to vector<8x128xf32>
    %96 = arith.select %93, %95, %85 : vector<8x128xi1>, vector<8x128xf32>
    %c25 = arith.constant 25 : index
    %97 = memref.load %arg2[%c25] : memref<30xf32, #tpu.memory_space<smem>>
    %98 = vector.broadcast %97 : f32 to vector<8x128xf32>
    %99 = arith.select %93, %98, %88 : vector<8x128xi1>, vector<8x128xf32>
    %c26 = arith.constant 26 : index
    %100 = memref.load %arg2[%c26] : memref<30xf32, #tpu.memory_space<smem>>
    %101 = vector.broadcast %100 : f32 to vector<8x128xf32>
    %102 = arith.select %93, %101, %91 : vector<8x128xi1>, vector<8x128xf32>
    %c9_i32 = arith.constant 9 : i32
    %103 = vector.broadcast %c9_i32 : i32 to vector<8x128xi32>
    %104 = arith.cmpi eq, %0, %103 : vector<8x128xi32>
    %c27 = arith.constant 27 : index
    %105 = memref.load %arg2[%c27] : memref<30xf32, #tpu.memory_space<smem>>
    %106 = vector.broadcast %105 : f32 to vector<8x128xf32>
    %107 = arith.select %104, %106, %96 : vector<8x128xi1>, vector<8x128xf32>
    %c28 = arith.constant 28 : index
    %108 = memref.load %arg2[%c28] : memref<30xf32, #tpu.memory_space<smem>>
    %109 = vector.broadcast %108 : f32 to vector<8x128xf32>
    %110 = arith.select %104, %109, %99 : vector<8x128xi1>, vector<8x128xf32>
    %c29 = arith.constant 29 : index
    %111 = memref.load %arg2[%c29] : memref<30xf32, #tpu.memory_space<smem>>
    %112 = vector.broadcast %111 : f32 to vector<8x128xf32>
    %113 = arith.select %104, %112, %102 : vector<8x128xi1>, vector<8x128xf32>
    %c0_4 = arith.constant 0 : index
    %c0_5 = arith.constant 0 : index
    %c0_6 = arith.constant 0 : index
    %114 = vector.load %arg3[%c0_4, %c0_5, %c0_6] : memref<3x8x128xf32, #tpu.memory_space<vmem>>, vector<1x8x128xf32>
    %115 = vector.shape_cast %114 : vector<1x8x128xf32> to vector<8x128xf32>
    %116 = vector.shape_cast %107 : vector<8x128xf32> to vector<1x8x128xf32>
    tpu.vector_store %arg3[%c0_4, %c0_5, %c0_6], %116 {strides = array<i32>} : memref<3x8x128xf32, #tpu.memory_space<vmem>>, vector<1x8x128xf32>,
    %c1_7 = arith.constant 1 : index
    %c0_8 = arith.constant 0 : index
    %c0_9 = arith.constant 0 : index
    %117 = vector.load %arg3[%c1_7, %c0_8, %c0_9] : memref<3x8x128xf32, #tpu.memory_space<vmem>>, vector<1x8x128xf32>
    %118 = vector.shape_cast %117 : vector<1x8x128xf32> to vector<8x128xf32>
    %119 = vector.shape_cast %110 : vector<8x128xf32> to vector<1x8x128xf32>
    tpu.vector_store %arg3[%c1_7, %c0_8, %c0_9], %119 {strides = array<i32>} : memref<3x8x128xf32, #tpu.memory_space<vmem>>, vector<1x8x128xf32>,
    %c2_10 = arith.constant 2 : index
    %c0_11 = arith.constant 0 : index
    %c0_12 = arith.constant 0 : index
    %120 = vector.load %arg3[%c2_10, %c0_11, %c0_12] : memref<3x8x128xf32, #tpu.memory_space<vmem>>, vector<1x8x128xf32>
    %121 = vector.shape_cast %120 : vector<1x8x128xf32> to vector<8x128xf32>
    %122 = vector.shape_cast %113 : vector<8x128xf32> to vector<1x8x128xf32>
    tpu.vector_store %arg3[%c2_10, %c0_11, %c0_12], %122 {strides = array<i32>} : memref<3x8x128xf32, #tpu.memory_space<vmem>>, vector<1x8x128xf32>,
    return
  }
  func.func @transform_0(%arg0: i32) -> (i32, i32) {
    %c0_i32 = arith.constant 0 : i32
    %c0_i32_0 = arith.constant 0 : i32
    return %arg0, %c0_i32 : i32, i32
  }
  func.func @transform_1(%arg0: i32) -> i32 {
    %c0_i32 = arith.constant 0 : i32
    %c0_i32_0 = arith.constant 0 : i32
    return %c0_i32 : i32
  }
  func.func @transform_2(%arg0: i32) -> (i32, i32, i32) {
    %c0_i32 = arith.constant 0 : i32
    %c0_i32_0 = arith.constant 0 : i32
    %c0_i32_1 = arith.constant 0 : i32
    return %c0_i32, %arg0, %c0_i32_0 : i32, i32, i32
  }
}

</mosaic_0001>

<bundles_post_ra>
// kernel: tpu_custom_call.1
= control target key start
LH: loop header
LB: loop body
LE: loop exit
PB: predicated region body
PF: predicated region fallthrough
CT: control target
= control target key end

     0   :  { %7 = vsyncpa [#allocation3], 0  ;;  %s457_s0 = inlined_call_operand.hbm [shape: s32[8,128], index: 0, kind: input, shape index: {}]   ;;  %s458_s1 = inlined_call_operand.vmem [shape: f32[30], index: 1, kind: input, shape index: {}]   ;;  %s459_s2 = inlined_call_operand.hbm [shape: f32[3,8,128], index: 2, kind: output, shape index: {}]  }
   0x1   :  { %8 = vsyncpa [#allocation5], 0 }
   0x2   :  { %9 = vsyncpa [#allocation4], 0  ;;  %s26_s11 = sshll.u32 %s458_s1, 4  ;;  %s257_s12 = smov [#allocation2]   ;;  %s27_s11 = int_to_ptr.vmem [resolvable:$true] %s26_s11 }
   0x3   :  { %s16_s13 = sshll.u32 %s257_s12, 4  ;;  %s195_s16 = scalar_lea.hbm %s457_s0, 128  ;;  %s17_s13 = int_to_ptr.vmem [resolvable:$true] %s16_s13 }
   0x4   :  { %p196_p0 = scmp.ne.s32.totalorder %s457_s0, %s195_s16  ;;  %p199_p1 = scmp.lt.u32.totalorder %s195_s16, %s457_s0 }
   0x6   :  { %p201_p2 = pnand %p199_p1, %p196_p0 }
   0x8   :  { %204 = shalt.err (!%p201_p2)
}
   0x9   :  { %s205_s21 = scalar_lea.vmem %s17_s13, 128  ;;  %p210_p4 = scmp.lt.s32.totalorder %s17_s13, %s17_s13 }
   0xa   :  { %p206_p3 = scmp.ne.s32.totalorder %s17_s13, %s205_s21  ;;  %p211_p5 = scmp.lt.s32.totalorder %s205_s21, %s205_s21 }
   0xc   :  { %p212_p6 = por %p211_p5, %p210_p4 }
   0xe   :  { %p213_p7 = pnand %p212_p6, %p206_p3 }
  0x10   :  { %216 = shalt.err (!%p213_p7)
}
  0x11   :  { %19 = dma.hbm_to_vmem [thread:$0]  %s457_s0, 128, %s17_s13, [#allocation3]  }
  0x12   :  { %s217_s23 = scalar_lea.vmem %s27_s11, 16  ;;  %p222_p9 = scmp.lt.s32.totalorder %s27_s11, %s27_s11 }
  0x13   :  { %p218_p8 = scmp.ne.s32.totalorder %s27_s11, %s217_s23  ;;  %p223_p10 = scmp.lt.s32.totalorder %s217_s23, %s217_s23 }
  0x15   :  { %p224_p11 = por %p223_p10, %p222_p9 }
  0x17   :  { %p225_p12 = pnand %p224_p11, %p218_p8 }
  0x19   :  { %228 = shalt.err (!%p225_p12)
}
  0x1a   :  { %s258_s24 = smov [#allocation6]  }
  0x1b   :  { %29 = dma.vmem_to_smem %s27_s11, 16, %s258_s24, [#allocation5]  }
  0x1c   :  { %251 = dma.done.wait [#allocation3], 128  }
  0x1d   :  { %252 = vsyncadd [#allocation3], 4294967168 }
  0x1e   :  { %253 = dma.done.wait [#allocation5], 16  }
  0x1f   :  { %254 = vsyncadd [#allocation5], 4294967280 }
  0x20   :  { %36 = sfence }
  0x21   :  { %s39_s25 = sld [smem:[#allocation6]]  ;;  %s163_s26 = sld [smem:[#allocation6 + $0x3]]  ;;  %v292_v0 = vld [vmem:[#allocation2] sm:$0xff] }
  0x22   :  { %s166_s27 = sld [smem:[#allocation6 + $0x6]]  ;;  %s294_s0 = sld [smem:[#allocation6 + $0x9]]  ;;  %vm38_vm0 = vcmp.eq.s32.totalorder %v292_v0, 0  ;;  %vm48_vm1 = vcmp.eq.s32.totalorder %v292_v0, 1  ;;  %vm58_vm2 = vcmp.eq.s32.totalorder %v292_v0, 2  ;;  %vm68_vm3 = vcmp.eq.s32.totalorder %v292_v0, 3 }
  0x23   :  { %s296_s28 = sld [smem:[#allocation6 + $0xc]]  ;;  %s298_s29 = sld [smem:[#allocation6 + $0xf]]  ;;  %vm78_vm4 = vcmp.eq.s32.totalorder %v292_v0, 4  ;;  %vm88_vm5 = vcmp.eq.s32.totalorder %v292_v0, 5  ;;  %vm98_vm6 = vcmp.eq.s32.totalorder %v292_v0, 6  ;;  %vm108_vm7 = vcmp.eq.s32.totalorder %v292_v0, 7 }
  0x24   :  { %s300_s30 = sld [smem:[#allocation6 + $0x12]]  ;;  %s303_s3 = sld [smem:[#allocation6 + $0x15]]  ;;  %vm118_vm8 = vcmp.eq.s32.totalorder %v292_v0, 8  ;;  %vm128_vm9 = vcmp.eq.s32.totalorder %v292_v0, 9 }
  0x25   :  { %s305_s4 = sld [smem:[#allocation6 + $0x18]]  ;;  %s309_s5 = sld [smem:[#allocation6 + $0x1b]] }
  0x26   :  { %s311_s6 = sld [smem:[#allocation6 + $0x1]]  ;;  %s315_s7 = sld [smem:[#allocation6 + $0x4]] }
  0x27   :  { %v40_v1 = vstv %s39_s25  ;;  %v50_v2 = vstv %s163_s26  ;;  %s317_s8 = sld [smem:[#allocation6 + $0x7]]  ;;  %s322_s9 = sld [smem:[#allocation6 + $0xa]] }
  0x28   :  { %v41_v3 = vsel %vm38_vm0, %v40_v1, 0.0  ;;  %v60_v4 = vstv %s166_s27  ;;  %s324_s10 = sld [smem:[#allocation6 + $0xd]]  ;;  %v70_v6 = vstv %s294_s0  ;;  %s331_s11 = sld [smem:[#allocation6 + $0x10]] }
  0x29   :  { %v51_v5 = vsel %vm48_vm1, %v50_v2, %v41_v3  ;;  %v80_v7 = vstv %s296_s28  ;;  %s333_s12 = sld [smem:[#allocation6 + $0x13]]  ;;  %v90_v9 = vstv %s298_s29  ;;  %s340_s13 = sld [smem:[#allocation6 + $0x16]] }
  0x2a   :  { %v61_v8 = vsel %vm58_vm2, %v60_v4, %v51_v5  ;;  %s342_s14 = sld [smem:[#allocation6 + $0x19]]  ;;  %v100_v11 = vstv %s300_s30  ;;  %v110_v12 = vstv %s303_s3  ;;  %s349_s15 = sld [smem:[#allocation6 + $0x1c]] }
  0x2b   :  { %v71_v10 = vsel %vm68_vm3, %v70_v6, %v61_v8  ;;  %s351_s16 = sld [smem:[#allocation6 + $0x2]]  ;;  %v120_v14 = vstv %s305_s4  ;;  %v130_v15 = vstv %s309_s5  ;;  %s358_s17 = sld [smem:[#allocation6 + $0x5]] }
  0x2c   :  { %v81_v13 = vsel %vm78_vm4, %v80_v7, %v71_v10  ;;  %v43_v16 = vstv %s311_s6  ;;  %s360_s18 = sld [smem:[#allocation6 + $0x8]]  ;;  %v53_v19 = vstv %s315_s7  ;;  %s368_s19 = sld [smem:[#allocation6 + $0xb]] }
  0x2d   :  { %v91_v17 = vsel %vm88_vm5, %v90_v9, %v81_v13  ;;  %v44_v18 = vsel %vm38_vm0, %v43_v16, 0.0  ;;  %v63_v20 = vstv %s317_s8  ;;  %s370_s20 = sld [smem:[#allocation6 + $0xe]]  ;;  %v73_v23 = vstv %s322_s9  ;;  %s378_s21 = sld [smem:[#allocation6 + $0x11]] }
  0x2e   :  { %v101_v21 = vsel %vm98_vm6, %v100_v11, %v91_v17  ;;  %v54_v22 = vsel %vm48_vm1, %v53_v19, %v44_v18  ;;  %v83_v24 = vstv %s324_s10  ;;  %s380_s1 = sld [smem:[#allocation6 + $0x14]]  ;;  %v93_v27 = vstv %s331_s11  ;;  %s388_s22 = sld [smem:[#allocation6 + $0x17]] }
  0x2f   :  { %v111_v25 = vsel %vm108_vm7, %v110_v12, %v101_v21  ;;  %v64_v26 = vsel %vm58_vm2, %v63_v20, %v54_v22  ;;  %v103_v28 = vstv %s333_s12  ;;  %s390_s23 = sld [smem:[#allocation6 + $0x1a]]  ;;  %v113_v31 = vstv %s340_s13  ;;  %s398_s24 = sld [smem:[#allocation6 + $0x1d]] }
  0x30   :  { %v121_v29 = vsel %vm118_vm8, %v120_v14, %v111_v25  ;;  %v74_v30 = vsel %vm68_vm3, %v73_v23, %v64_v26  ;;  %v123_v32 = vstv %s342_s14  ;;  %v133_v35 = vstv %s349_s15  ;;  %s259_s25 = smov [#allocation7]  }
  0x31   :  { %v131_v33 = vsel %vm128_vm9, %v130_v15, %v121_v29  ;;  %v84_v34 = vsel %vm78_vm4, %v83_v24, %v74_v30  ;;  %v46_v36 = vstv %s351_s16  ;;  %v56_v39 = vstv %s358_s17  ;;  %s148_s26 = sshll.u32 %s259_s25, 4  ;;  %s149_s26 = int_to_ptr.vmem [resolvable:$true] %s148_s26 }
  0x32   :  { %138 = vst [vmem:[#allocation7] sm:$0xff] %v131_v33  ;;  %v94_v37 = vsel %vm88_vm5, %v93_v27, %v84_v34  ;;  %v47_v38 = vsel %vm38_vm0, %v46_v36, 0.0  ;;  %v66_v40 = vstv %s360_s18  ;;  %v76_v43 = vstv %s368_s19  ;;  %s229_s27 = scalar_lea.vmem %s149_s26, 384  ;;  %p234_p0 = scmp.lt.s32.totalorder %s149_s26, %s149_s26 }
  0x33   :  { %v104_v41 = vsel %vm98_vm6, %v103_v28, %v94_v37  ;;  %v57_v42 = vsel %vm48_vm1, %v56_v39, %v47_v38  ;;  %v86_v44 = vstv %s370_s20  ;;  %v96_v47 = vstv %s378_s21  ;;  %p230_p13 = scmp.ne.s32.totalorder %s149_s26, %s229_s27  ;;  %p235_p1 = scmp.lt.s32.totalorder %s229_s27, %s229_s27 }
  0x34   :  { %v114_v45 = vsel %vm108_vm7, %v113_v31, %v104_v41  ;;  %v67_v46 = vsel %vm58_vm2, %v66_v40, %v57_v42  ;;  %v106_v50 = vstv %s380_s1  ;;  %v116_v53 = vstv %s388_s22 }
  0x35   :  { %v124_v48 = vsel %vm118_vm8, %v123_v32, %v114_v45  ;;  %v77_v49 = vsel %vm68_vm3, %v76_v43, %v67_v46  ;;  %v126_v55 = vstv %s390_s23  ;;  %v136_v57 = vstv %s398_s24  ;;  %p236_p2 = por %p235_p1, %p234_p0 }
  0x36   :  { %v134_v51 = vsel %vm128_vm9, %v133_v35, %v124_v48  ;;  %v87_v52 = vsel %vm78_vm4, %v86_v44, %v77_v49 }
  0x37   :  { %140 = vst [vmem:[#allocation7 + $0x8] sm:$0xff] %v134_v51  ;;  %v97_v54 = vsel %vm88_vm5, %v96_v47, %v87_v52  ;;  %p237_p3 = pnand %p236_p2, %p230_p13 }
  0x38   :  { %v107_v56 = vsel %vm98_vm6, %v106_v50, %v97_v54 }
  0x39   :  { %v117_v58 = vsel %vm108_vm7, %v116_v53, %v107_v56 }
  0x3a   :  { %v127_v59 = vsel %vm118_vm8, %v126_v55, %v117_v58 }
  0x3b   :  { %v137_v60 = vsel %vm128_vm9, %v136_v57, %v127_v59 }
  0x3c   :  { %142 = vst [vmem:[#allocation7 + $0x10] sm:$0xff] %v137_v60 }
  0x3d   :  { %240 = shalt.err (!%p237_p3)
}
  0x3e   :  { %s241_s29 = scalar_lea.hbm %s459_s2, 384 }
  0x3f   :  { %p242_p4 = scmp.ne.s32.totalorder %s459_s2, %s241_s29  ;;  %p245_p5 = scmp.lt.u32.totalorder %s241_s29, %s459_s2 }
  0x41   :  { %p247_p6 = pnand %p245_p5, %p242_p4 }
  0x43   :  { %250 = shalt.err (!%p247_p6)
}
  0x44   :  { %s260_s6 = smov 128   ;;  %s261_s7 = smov 8  }
  0x45   :  { %154 = dma.vmem_to_hbm [thread:$0]  %s149_s26, 384, %s459_s2, [#allocation4], %s260_s6, %s260_s6, %s261_s7  }
  0x46   :  { %255 = dma.done.wait [#allocation4], 384  }
  0x47   :  { %256 = vsyncadd [#allocation4], 4294966912 }
  0x48   :  { %158 = vsyncpa [#allocation3], 1 }
  0x49   :  { %159 = vsyncpa [#allocation4], 1 }
  0x4a   :  { %160 = vsyncpa [#allocation5], 1 }

</bundles_post_ra>
